<compile_context>
chip_gen: v5e
topology: v5e:2x2
jax: 0.10.0
libtpu: 0.0.40
codegen_flags: <defaults>
</compile_context>

<pallas_src>
import math
import functools

import jax
import jax.numpy as jnp
from jax.experimental import pallas as pl
from jax.experimental.pallas import tpu as pltpu


def _round_up(x, m):
    return ((x + m - 1) // m) * m


def _conv3d_tap_kernel(w_ref, b_ref, x0_ref, x1_ref, o_ref, *,
                       tap_offsets, tl):
    """One (batch, L-tile) output block.

    w_ref : (K^3, Cout_p, Cin_p) bf16   resident (constant index map)
    b_ref : (Cout_p, 1)          f32    resident
    x0_ref: (1, Cin_p, TL)       bf16   flat-spatial tile j
    x1_ref: (1, Cin_p, TL)       bf16   flat-spatial tile j+1
    o_ref : (1, Cout_p, TL)             output tile j
    """
    # Window covering every shifted tap read for this tile: [j*TL, (j+2)*TL).
    xw = jnp.concatenate([x0_ref[0], x1_ref[0]], axis=-1)   # (Cin_p, 2*TL)

    cout_p = o_ref.shape[1]
    acc = jnp.zeros((cout_p, tl), jnp.float32)
    # Unrolled tap loop: each tap is a shifted lane-slice + MXU matmul,
    # accumulated in f32.
    for t, off in enumerate(tap_offsets):
        acc = acc + jnp.dot(w_ref[t], xw[:, off:off + tl],
                            preferred_element_type=jnp.float32)

    # Bias add + cast exactly once per output tile.
    o_ref[0] = (acc + b_ref[...]).astype(o_ref.dtype)


@functools.partial(jax.jit, static_argnames=("padding", "stride"))
def conv3d_pallas(x, weight, bias, *, padding=0, stride=1):
    """x: [B, Cin, D, H, W]; weight: [Cout, Cin, K, K, K]; bias: [Cout]."""
    B, Cin, D, H, W = x.shape
    Cout, _, K, _, _ = weight.shape
    p, s = padding, stride

    Do = (D + 2 * p - K) // s + 1
    Ho = (H + 2 * p - K) // s + 1
    Wo = (W + 2 * p - K) // s + 1

    # Pad spatially (if requested) and flatten spatial dims.
    xp = jnp.pad(x, ((0, 0), (0, 0), (p, p), (p, p), (p, p))) if p > 0 else x
    Dp, Hp, Wp = D + 2 * p, H + 2 * p, W + 2 * p
    N = Dp * Hp * Wp

    # Tap offsets in the flattened (padded) input index space.
    tap_offsets = tuple(kd * Hp * Wp + kh * Wp + kw
                        for kd in range(K) for kh in range(K) for kw in range(K))
    off_max = tap_offsets[-1]
    K3 = K * K * K

    # Lane tile along the flattened spatial axis: multiple of 128 (lane-dense
    # stores, 256 to feed the 256-wide MXU) and >= off_max so two adjacent
    # tiles cover any shifted tap window.
    TL = max(256, _round_up(off_max, 128))
    assert off_max <= TL
    n_tiles = pl.cdiv(N, TL)
    N_pad = n_tiles * TL
    N_in = (n_tiles + 1) * TL          # extra tile so block j+1 always exists

    # Channel padding for aligned sublane tiles (bf16 packs 16 per sublane tile).
    Cin_p = _round_up(Cin, 16)
    Cout_p = _round_up(Cout, 8)

    # bf16 operands (f32 accumulation inside the kernel).
    x_flat = xp.reshape(B, Cin, N).astype(jnp.bfloat16)
    x_flat = jnp.pad(x_flat, ((0, 0), (0, Cin_p - Cin), (0, N_in - N)))

    w_taps = jnp.transpose(weight, (2, 3, 4, 0, 1)).reshape(K3, Cout, Cin)
    w_taps = jnp.pad(w_taps, ((0, 0), (0, Cout_p - Cout), (0, Cin_p - Cin)))
    w_taps = w_taps.astype(jnp.bfloat16)

    b2 = jnp.pad(bias.astype(jnp.float32), (0, Cout_p - Cout)).reshape(Cout_p, 1)

    kernel = functools.partial(_conv3d_tap_kernel,
                               tap_offsets=tap_offsets, tl=TL)

    # Advisory cost model for XLA scheduling around the custom call.
    flops = 2 * B * Cout * Cin * K3 * Do * Ho * Wo
    bytes_accessed = (x_flat.size * 2 + w_taps.size * 2 + b2.size * 4
                      + B * Cout_p * N_pad * x.dtype.itemsize)
    cost = pl.CostEstimate(flops=flops, transcendentals=0,
                           bytes_accessed=bytes_accessed)

    # VMEM budget: 2 input specs x 2 buffers, double-buffered output,
    # resident weights/bias, concat + accumulator temporaries. Generous
    # headroom, clamped well under every generation's physical VMEM.
    vmem_est = (2 * 2 * Cin_p * TL * 2          # x0/x1 blocks (bf16), double-buffered
                + 2 * Cout_p * TL * x.dtype.itemsize   # output blocks
                + K3 * Cout_p * Cin_p * 2 + Cout_p * 4  # resident weight + bias
                + Cin_p * 2 * TL * 2            # concatenated window temp
                + Cout_p * TL * 4)              # f32 accumulator
    vmem_limit = int(min(max(4 * vmem_est, 16 * 1024 * 1024), 48 * 1024 * 1024))

    y = pl.pallas_call(
        kernel,
        out_shape=jax.ShapeDtypeStruct((B, Cout_p, N_pad), x.dtype),
        grid_spec=pltpu.PrefetchScalarGridSpec(
            num_scalar_prefetch=0,
            grid=(B, n_tiles),
            in_specs=[
                pl.BlockSpec((K3, Cout_p, Cin_p), lambda b, j: (0, 0, 0)),
                pl.BlockSpec((Cout_p, 1), lambda b, j: (0, 0)),
                pl.BlockSpec((1, Cin_p, TL), lambda b, j: (b, 0, j)),
                pl.BlockSpec((1, Cin_p, TL), lambda b, j: (b, 0, j + 1)),
            ],
            out_specs=pl.BlockSpec((1, Cout_p, TL), lambda b, j: (b, 0, j)),
        ),
        compiler_params=pltpu.CompilerParams(
            dimension_semantics=("parallel", "parallel"),
            vmem_limit_bytes=vmem_limit,
        ),
        cost_estimate=cost,
    )(w_taps, b2, x_flat, x_flat)

    # y[b, co, d*Hp*Wp + h*Wp + w] is the conv output for the window starting
    # at padded-input position (d, h, w); valid outputs start at multiples of
    # the stride.  Extract them with a cheap strided slice.
    y = y[:, :Cout, :N].reshape(B, Cout, Dp, Hp, Wp)
    y = y[:, :,
          0:(Do - 1) * s + 1:s,
          0:(Ho - 1) * s + 1:s,
          0:(Wo - 1) * s + 1:s]
    return y


def init_conv3d_params(key, input_channels, output_channels, kernel_size):
    """Deterministic init mirroring the PyTorch module's reset_parameters()."""
    kw, kb = jax.random.split(key)
    fan_in = input_channels * kernel_size ** 3
    # kaiming_uniform_ with a=sqrt(5): gain = sqrt(2/(1+5)) -> bound = sqrt(1/fan_in)
    w_bound = math.sqrt(1.0 / fan_in)
    weight = jax.random.uniform(
        kw,
        (output_channels, input_channels, kernel_size, kernel_size, kernel_size),
        minval=-w_bound, maxval=w_bound, dtype=jnp.float32)
    b_bound = 1.0 / math.sqrt(fan_in)
    bias = jax.random.uniform(
        kb, (output_channels,), minval=-b_bound, maxval=b_bound, dtype=jnp.float32)
    return weight, bias


def _reference_conv3d(x, weight, bias, padding, stride):
    """Pure-JAX reference (lax conv, f32 accumulation) for correctness checking."""
    out = jax.lax.conv_general_dilated(
        x, weight,
        window_strides=(stride, stride, stride),
        padding=[(padding, padding)] * 3,
        dimension_numbers=("NCDHW", "OIDHW", "NCDHW"),
        preferred_element_type=jnp.float32,
        precision=jax.lax.Precision.HIGHEST,
    )
    return out + bias.reshape(1, -1, 1, 1, 1)


if __name__ == "__main__":
    key = jax.random.PRNGKey(0)
    k_x, k_p = jax.random.split(key)

    batch, in_channels, out_channels = 2, 4, 8
    depth = height = width = 8
    kernel_size = 3
    padding, stride = 0, 1   # the only configuration the PyTorch reference supports

    x = jax.random.normal(k_x, (batch, in_channels, depth, height, width),
                          dtype=jnp.float32)
    weight, bias = init_conv3d_params(k_p, in_channels, out_channels, kernel_size)

    out = conv3d_pallas(x, weight, bias, padding=padding, stride=stride)
    out = jax.block_until_ready(out)

    # Kernel uses bf16 operands with f32 accumulation; compare against the same
    # bf16-rounded inputs so the check isolates the kernel math.
    x_bf = x.astype(jnp.bfloat16).astype(jnp.float32)
    w_bf = weight.astype(jnp.bfloat16).astype(jnp.float32)
    ref = _reference_conv3d(x_bf, w_bf, bias, padding, stride)

    assert out.shape == ref.shape, (out.shape, ref.shape)
    assert jnp.allclose(out, ref, atol=1e-3, rtol=1e-3), "mismatch vs JAX reference"

    print("KERNEL_OK")
</pallas_src>

<mosaic_0001>
module attributes {stable_mosaic.version = 11 : i64} {
  func.func @_conv3d_tap_kernel(%arg0: i32, %arg1: i32, %arg2: memref<27x8x16xbf16, #tpu.memory_space<vmem>>, %arg3: memref<8x1xf32, #tpu.memory_space<vmem>>, %arg4: memref<1x16x256xbf16, #tpu.memory_space<vmem>>, %arg5: memref<1x16x256xbf16, #tpu.memory_space<vmem>>, %arg6: memref<1x8x256xf32, #tpu.memory_space<vmem>>) attributes {dimension_semantics = [#tpu.dimension_semantics<parallel>, #tpu.dimension_semantics<parallel>], iteration_bounds = array<i64: 2, 2>, scalar_prefetch = 0 : i64, scratch_operands = 0 : i64, tpu.core_type = #tpu.core_type<tc>, window_params = [{pipeline_mode = #tpu.pipeline_mode<synchronous>, transform_indices = @transform_0, window_bounds = array<i64: 27, 8, 16>}, {pipeline_mode = #tpu.pipeline_mode<synchronous>, transform_indices = @transform_1, window_bounds = array<i64: 8, 1>}, {transform_indices = @transform_2, window_bounds = array<i64: 1, 16, 256>}, {transform_indices = @transform_3, window_bounds = array<i64: 1, 16, 256>}, {transform_indices = @transform_4, window_bounds = array<i64: 1, 8, 256>}]} {
    %c0 = arith.constant 0 : index
    %c0_0 = arith.constant 0 : index
    %c0_1 = arith.constant 0 : index
    %0 = vector.load %arg4[%c0, %c0_0, %c0_1] : memref<1x16x256xbf16, #tpu.memory_space<vmem>>, vector<1x16x256xbf16>
    %1 = vector.shape_cast %0 : vector<1x16x256xbf16> to vector<16x256xbf16>
    %c0_2 = arith.constant 0 : index
    %c0_3 = arith.constant 0 : index
    %c0_4 = arith.constant 0 : index
    %2 = vector.load %arg5[%c0_2, %c0_3, %c0_4] : memref<1x16x256xbf16, #tpu.memory_space<vmem>>, vector<1x16x256xbf16>
    %3 = vector.shape_cast %2 : vector<1x16x256xbf16> to vector<16x256xbf16>
    %4 = tpu.concatenate %1, %3 in 1 : vector<16x256xbf16>, vector<16x256xbf16> -> vector<16x512xbf16>
    %cst = arith.constant 0.000000e+00 : f32
    %5 = vector.broadcast %cst : f32 to vector<8x256xf32>
    %c0_5 = arith.constant 0 : index
    %c0_6 = arith.constant 0 : index
    %c0_7 = arith.constant 0 : index
    %6 = vector.load %arg2[%c0_5, %c0_6, %c0_7] : memref<27x8x16xbf16, #tpu.memory_space<vmem>>, vector<1x8x16xbf16>
    %7 = vector.shape_cast %6 : vector<1x8x16xbf16> to vector<8x16xbf16>
    %8 = vector.extract_strided_slice %4 {offsets = [0, 0], sizes = [16, 256], strides = [1, 1]} : vector<16x512xbf16> to vector<16x256xbf16>
    %cst_8 = arith.constant dense<0.000000e+00> : vector<8x256xf32>
    %9 = tpu.matmul %7, %8, %cst_8 {dimension_numbers = #tpu.dot_dimension_numbers<[1], [0], [0], [1], [0, 0, 1, 1], [], []>} : vector<8x16xbf16>, vector<16x256xbf16>, vector<8x256xf32> -> vector<8x256xf32>
    %10 = arith.addf %5, %9 : vector<8x256xf32>
    %c1 = arith.constant 1 : index
    %c0_9 = arith.constant 0 : index
    %c0_10 = arith.constant 0 : index
    %11 = vector.load %arg2[%c1, %c0_9, %c0_10] : memref<27x8x16xbf16, #tpu.memory_space<vmem>>, vector<1x8x16xbf16>
    %12 = vector.shape_cast %11 : vector<1x8x16xbf16> to vector<8x16xbf16>
    %13 = vector.extract_strided_slice %4 {offsets = [0, 1], sizes = [16, 256], strides = [1, 1]} : vector<16x512xbf16> to vector<16x256xbf16>
    %cst_11 = arith.constant dense<0.000000e+00> : vector<8x256xf32>
    %14 = tpu.matmul %12, %13, %cst_11 {dimension_numbers = #tpu.dot_dimension_numbers<[1], [0], [0], [1], [0, 0, 1, 1], [], []>} : vector<8x16xbf16>, vector<16x256xbf16>, vector<8x256xf32> -> vector<8x256xf32>
    %15 = arith.addf %10, %14 : vector<8x256xf32>
    %c2 = arith.constant 2 : index
    %c0_12 = arith.constant 0 : index
    %c0_13 = arith.constant 0 : index
    %16 = vector.load %arg2[%c2, %c0_12, %c0_13] : memref<27x8x16xbf16, #tpu.memory_space<vmem>>, vector<1x8x16xbf16>
    %17 = vector.shape_cast %16 : vector<1x8x16xbf16> to vector<8x16xbf16>
    %18 = vector.extract_strided_slice %4 {offsets = [0, 2], sizes = [16, 256], strides = [1, 1]} : vector<16x512xbf16> to vector<16x256xbf16>
    %cst_14 = arith.constant dense<0.000000e+00> : vector<8x256xf32>
    %19 = tpu.matmul %17, %18, %cst_14 {dimension_numbers = #tpu.dot_dimension_numbers<[1], [0], [0], [1], [0, 0, 1, 1], [], []>} : vector<8x16xbf16>, vector<16x256xbf16>, vector<8x256xf32> -> vector<8x256xf32>
    %20 = arith.addf %15, %19 : vector<8x256xf32>
    %c3 = arith.constant 3 : index
    %c0_15 = arith.constant 0 : index
    %c0_16 = arith.constant 0 : index
    %21 = vector.load %arg2[%c3, %c0_15, %c0_16] : memref<27x8x16xbf16, #tpu.memory_space<vmem>>, vector<1x8x16xbf16>
    %22 = vector.shape_cast %21 : vector<1x8x16xbf16> to vector<8x16xbf16>
    %23 = vector.extract_strided_slice %4 {offsets = [0, 8], sizes = [16, 256], strides = [1, 1]} : vector<16x512xbf16> to vector<16x256xbf16>
    %cst_17 = arith.constant dense<0.000000e+00> : vector<8x256xf32>
    %24 = tpu.matmul %22, %23, %cst_17 {dimension_numbers = #tpu.dot_dimension_numbers<[1], [0], [0], [1], [0, 0, 1, 1], [], []>} : vector<8x16xbf16>, vector<16x256xbf16>, vector<8x256xf32> -> vector<8x256xf32>
    %25 = arith.addf %20, %24 : vector<8x256xf32>
    %c4 = arith.constant 4 : index
    %c0_18 = arith.constant 0 : index
    %c0_19 = arith.constant 0 : index
    %26 = vector.load %arg2[%c4, %c0_18, %c0_19] : memref<27x8x16xbf16, #tpu.memory_space<vmem>>, vector<1x8x16xbf16>
    %27 = vector.shape_cast %26 : vector<1x8x16xbf16> to vector<8x16xbf16>
    %28 = vector.extract_strided_slice %4 {offsets = [0, 9], sizes = [16, 256], strides = [1, 1]} : vector<16x512xbf16> to vector<16x256xbf16>
    %cst_20 = arith.constant dense<0.000000e+00> : vector<8x256xf32>
    %29 = tpu.matmul %27, %28, %cst_20 {dimension_numbers = #tpu.dot_dimension_numbers<[1], [0], [0], [1], [0, 0, 1, 1], [], []>} : vector<8x16xbf16>, vector<16x256xbf16>, vector<8x256xf32> -> vector<8x256xf32>
    %30 = arith.addf %25, %29 : vector<8x256xf32>
    %c5 = arith.constant 5 : index
    %c0_21 = arith.constant 0 : index
    %c0_22 = arith.constant 0 : index
    %31 = vector.load %arg2[%c5, %c0_21, %c0_22] : memref<27x8x16xbf16, #tpu.memory_space<vmem>>, vector<1x8x16xbf16>
    %32 = vector.shape_cast %31 : vector<1x8x16xbf16> to vector<8x16xbf16>
    %33 = vector.extract_strided_slice %4 {offsets = [0, 10], sizes = [16, 256], strides = [1, 1]} : vector<16x512xbf16> to vector<16x256xbf16>
    %cst_23 = arith.constant dense<0.000000e+00> : vector<8x256xf32>
    %34 = tpu.matmul %32, %33, %cst_23 {dimension_numbers = #tpu.dot_dimension_numbers<[1], [0], [0], [1], [0, 0, 1, 1], [], []>} : vector<8x16xbf16>, vector<16x256xbf16>, vector<8x256xf32> -> vector<8x256xf32>
    %35 = arith.addf %30, %34 : vector<8x256xf32>
    %c6 = arith.constant 6 : index
    %c0_24 = arith.constant 0 : index
    %c0_25 = arith.constant 0 : index
    %36 = vector.load %arg2[%c6, %c0_24, %c0_25] : memref<27x8x16xbf16, #tpu.memory_space<vmem>>, vector<1x8x16xbf16>
    %37 = vector.shape_cast %36 : vector<1x8x16xbf16> to vector<8x16xbf16>
    %38 = vector.extract_strided_slice %4 {offsets = [0, 16], sizes = [16, 256], strides = [1, 1]} : vector<16x512xbf16> to vector<16x256xbf16>
    %cst_26 = arith.constant dense<0.000000e+00> : vector<8x256xf32>
    %39 = tpu.matmul %37, %38, %cst_26 {dimension_numbers = #tpu.dot_dimension_numbers<[1], [0], [0], [1], [0, 0, 1, 1], [], []>} : vector<8x16xbf16>, vector<16x256xbf16>, vector<8x256xf32> -> vector<8x256xf32>
    %40 = arith.addf %35, %39 : vector<8x256xf32>
    %c7 = arith.constant 7 : index
    %c0_27 = arith.constant 0 : index
    %c0_28 = arith.constant 0 : index
    %41 = vector.load %arg2[%c7, %c0_27, %c0_28] : memref<27x8x16xbf16, #tpu.memory_space<vmem>>, vector<1x8x16xbf16>
    %42 = vector.shape_cast %41 : vector<1x8x16xbf16> to vector<8x16xbf16>
    %43 = vector.extract_strided_slice %4 {offsets = [0, 17], sizes = [16, 256], strides = [1, 1]} : vector<16x512xbf16> to vector<16x256xbf16>
    %cst_29 = arith.constant dense<0.000000e+00> : vector<8x256xf32>
    %44 = tpu.matmul %42, %43, %cst_29 {dimension_numbers = #tpu.dot_dimension_numbers<[1], [0], [0], [1], [0, 0, 1, 1], [], []>} : vector<8x16xbf16>, vector<16x256xbf16>, vector<8x256xf32> -> vector<8x256xf32>
    %45 = arith.addf %40, %44 : vector<8x256xf32>
    %c8 = arith.constant 8 : index
    %c0_30 = arith.constant 0 : index
    %c0_31 = arith.constant 0 : index
    %46 = vector.load %arg2[%c8, %c0_30, %c0_31] : memref<27x8x16xbf16, #tpu.memory_space<vmem>>, vector<1x8x16xbf16>
    %47 = vector.shape_cast %46 : vector<1x8x16xbf16> to vector<8x16xbf16>
    %48 = vector.extract_strided_slice %4 {offsets = [0, 18], sizes = [16, 256], strides = [1, 1]} : vector<16x512xbf16> to vector<16x256xbf16>
    %cst_32 = arith.constant dense<0.000000e+00> : vector<8x256xf32>
    %49 = tpu.matmul %47, %48, %cst_32 {dimension_numbers = #tpu.dot_dimension_numbers<[1], [0], [0], [1], [0, 0, 1, 1], [], []>} : vector<8x16xbf16>, vector<16x256xbf16>, vector<8x256xf32> -> vector<8x256xf32>
    %50 = arith.addf %45, %49 : vector<8x256xf32>
    %c9 = arith.constant 9 : index
    %c0_33 = arith.constant 0 : index
    %c0_34 = arith.constant 0 : index
    %51 = vector.load %arg2[%c9, %c0_33, %c0_34] : memref<27x8x16xbf16, #tpu.memory_space<vmem>>, vector<1x8x16xbf16>
    %52 = vector.shape_cast %51 : vector<1x8x16xbf16> to vector<8x16xbf16>
    %53 = vector.extract_strided_slice %4 {offsets = [0, 64], sizes = [16, 256], strides = [1, 1]} : vector<16x512xbf16> to vector<16x256xbf16>
    %cst_35 = arith.constant dense<0.000000e+00> : vector<8x256xf32>
    %54 = tpu.matmul %52, %53, %cst_35 {dimension_numbers = #tpu.dot_dimension_numbers<[1], [0], [0], [1], [0, 0, 1, 1], [], []>} : vector<8x16xbf16>, vector<16x256xbf16>, vector<8x256xf32> -> vector<8x256xf32>
    %55 = arith.addf %50, %54 : vector<8x256xf32>
    %c10 = arith.constant 10 : index
    %c0_36 = arith.constant 0 : index
    %c0_37 = arith.constant 0 : index
    %56 = vector.load %arg2[%c10, %c0_36, %c0_37] : memref<27x8x16xbf16, #tpu.memory_space<vmem>>, vector<1x8x16xbf16>
    %57 = vector.shape_cast %56 : vector<1x8x16xbf16> to vector<8x16xbf16>
    %58 = vector.extract_strided_slice %4 {offsets = [0, 65], sizes = [16, 256], strides = [1, 1]} : vector<16x512xbf16> to vector<16x256xbf16>
    %cst_38 = arith.constant dense<0.000000e+00> : vector<8x256xf32>
    %59 = tpu.matmul %57, %58, %cst_38 {dimension_numbers = #tpu.dot_dimension_numbers<[1], [0], [0], [1], [0, 0, 1, 1], [], []>} : vector<8x16xbf16>, vector<16x256xbf16>, vector<8x256xf32> -> vector<8x256xf32>
    %60 = arith.addf %55, %59 : vector<8x256xf32>
    %c11 = arith.constant 11 : index
    %c0_39 = arith.constant 0 : index
    %c0_40 = arith.constant 0 : index
    %61 = vector.load %arg2[%c11, %c0_39, %c0_40] : memref<27x8x16xbf16, #tpu.memory_space<vmem>>, vector<1x8x16xbf16>
    %62 = vector.shape_cast %61 : vector<1x8x16xbf16> to vector<8x16xbf16>
    %63 = vector.extract_strided_slice %4 {offsets = [0, 66], sizes = [16, 256], strides = [1, 1]} : vector<16x512xbf16> to vector<16x256xbf16>
    %cst_41 = arith.constant dense<0.000000e+00> : vector<8x256xf32>
    %64 = tpu.matmul %62, %63, %cst_41 {dimension_numbers = #tpu.dot_dimension_numbers<[1], [0], [0], [1], [0, 0, 1, 1], [], []>} : vector<8x16xbf16>, vector<16x256xbf16>, vector<8x256xf32> -> vector<8x256xf32>
    %65 = arith.addf %60, %64 : vector<8x256xf32>
    %c12 = arith.constant 12 : index
    %c0_42 = arith.constant 0 : index
    %c0_43 = arith.constant 0 : index
    %66 = vector.load %arg2[%c12, %c0_42, %c0_43] : memref<27x8x16xbf16, #tpu.memory_space<vmem>>, vector<1x8x16xbf16>
    %67 = vector.shape_cast %66 : vector<1x8x16xbf16> to vector<8x16xbf16>
    %68 = vector.extract_strided_slice %4 {offsets = [0, 72], sizes = [16, 256], strides = [1, 1]} : vector<16x512xbf16> to vector<16x256xbf16>
    %cst_44 = arith.constant dense<0.000000e+00> : vector<8x256xf32>
    %69 = tpu.matmul %67, %68, %cst_44 {dimension_numbers = #tpu.dot_dimension_numbers<[1], [0], [0], [1], [0, 0, 1, 1], [], []>} : vector<8x16xbf16>, vector<16x256xbf16>, vector<8x256xf32> -> vector<8x256xf32>
    %70 = arith.addf %65, %69 : vector<8x256xf32>
    %c13 = arith.constant 13 : index
    %c0_45 = arith.constant 0 : index
    %c0_46 = arith.constant 0 : index
    %71 = vector.load %arg2[%c13, %c0_45, %c0_46] : memref<27x8x16xbf16, #tpu.memory_space<vmem>>, vector<1x8x16xbf16>
    %72 = vector.shape_cast %71 : vector<1x8x16xbf16> to vector<8x16xbf16>
    %73 = vector.extract_strided_slice %4 {offsets = [0, 73], sizes = [16, 256], strides = [1, 1]} : vector<16x512xbf16> to vector<16x256xbf16>
    %cst_47 = arith.constant dense<0.000000e+00> : vector<8x256xf32>
    %74 = tpu.matmul %72, %73, %cst_47 {dimension_numbers = #tpu.dot_dimension_numbers<[1], [0], [0], [1], [0, 0, 1, 1], [], []>} : vector<8x16xbf16>, vector<16x256xbf16>, vector<8x256xf32> -> vector<8x256xf32>
    %75 = arith.addf %70, %74 : vector<8x256xf32>
    %c14 = arith.constant 14 : index
    %c0_48 = arith.constant 0 : index
    %c0_49 = arith.constant 0 : index
    %76 = vector.load %arg2[%c14, %c0_48, %c0_49] : memref<27x8x16xbf16, #tpu.memory_space<vmem>>, vector<1x8x16xbf16>
    %77 = vector.shape_cast %76 : vector<1x8x16xbf16> to vector<8x16xbf16>
    %78 = vector.extract_strided_slice %4 {offsets = [0, 74], sizes = [16, 256], strides = [1, 1]} : vector<16x512xbf16> to vector<16x256xbf16>
    %cst_50 = arith.constant dense<0.000000e+00> : vector<8x256xf32>
    %79 = tpu.matmul %77, %78, %cst_50 {dimension_numbers = #tpu.dot_dimension_numbers<[1], [0], [0], [1], [0, 0, 1, 1], [], []>} : vector<8x16xbf16>, vector<16x256xbf16>, vector<8x256xf32> -> vector<8x256xf32>
    %80 = arith.addf %75, %79 : vector<8x256xf32>
    %c15 = arith.constant 15 : index
    %c0_51 = arith.constant 0 : index
    %c0_52 = arith.constant 0 : index
    %81 = vector.load %arg2[%c15, %c0_51, %c0_52] : memref<27x8x16xbf16, #tpu.memory_space<vmem>>, vector<1x8x16xbf16>
    %82 = vector.shape_cast %81 : vector<1x8x16xbf16> to vector<8x16xbf16>
    %83 = vector.extract_strided_slice %4 {offsets = [0, 80], sizes = [16, 256], strides = [1, 1]} : vector<16x512xbf16> to vector<16x256xbf16>
    %cst_53 = arith.constant dense<0.000000e+00> : vector<8x256xf32>
    %84 = tpu.matmul %82, %83, %cst_53 {dimension_numbers = #tpu.dot_dimension_numbers<[1], [0], [0], [1], [0, 0, 1, 1], [], []>} : vector<8x16xbf16>, vector<16x256xbf16>, vector<8x256xf32> -> vector<8x256xf32>
    %85 = arith.addf %80, %84 : vector<8x256xf32>
    %c16 = arith.constant 16 : index
    %c0_54 = arith.constant 0 : index
    %c0_55 = arith.constant 0 : index
    %86 = vector.load %arg2[%c16, %c0_54, %c0_55] : memref<27x8x16xbf16, #tpu.memory_space<vmem>>, vector<1x8x16xbf16>
    %87 = vector.shape_cast %86 : vector<1x8x16xbf16> to vector<8x16xbf16>
    %88 = vector.extract_strided_slice %4 {offsets = [0, 81], sizes = [16, 256], strides = [1, 1]} : vector<16x512xbf16> to vector<16x256xbf16>
    %cst_56 = arith.constant dense<0.000000e+00> : vector<8x256xf32>
    %89 = tpu.matmul %87, %88, %cst_56 {dimension_numbers = #tpu.dot_dimension_numbers<[1], [0], [0], [1], [0, 0, 1, 1], [], []>} : vector<8x16xbf16>, vector<16x256xbf16>, vector<8x256xf32> -> vector<8x256xf32>
    %90 = arith.addf %85, %89 : vector<8x256xf32>
    %c17 = arith.constant 17 : index
    %c0_57 = arith.constant 0 : index
    %c0_58 = arith.constant 0 : index
    %91 = vector.load %arg2[%c17, %c0_57, %c0_58] : memref<27x8x16xbf16, #tpu.memory_space<vmem>>, vector<1x8x16xbf16>
    %92 = vector.shape_cast %91 : vector<1x8x16xbf16> to vector<8x16xbf16>
    %93 = vector.extract_strided_slice %4 {offsets = [0, 82], sizes = [16, 256], strides = [1, 1]} : vector<16x512xbf16> to vector<16x256xbf16>
    %cst_59 = arith.constant dense<0.000000e+00> : vector<8x256xf32>
    %94 = tpu.matmul %92, %93, %cst_59 {dimension_numbers = #tpu.dot_dimension_numbers<[1], [0], [0], [1], [0, 0, 1, 1], [], []>} : vector<8x16xbf16>, vector<16x256xbf16>, vector<8x256xf32> -> vector<8x256xf32>
    %95 = arith.addf %90, %94 : vector<8x256xf32>
    %c18 = arith.constant 18 : index
    %c0_60 = arith.constant 0 : index
    %c0_61 = arith.constant 0 : index
    %96 = vector.load %arg2[%c18, %c0_60, %c0_61] : memref<27x8x16xbf16, #tpu.memory_space<vmem>>, vector<1x8x16xbf16>
    %97 = vector.shape_cast %96 : vector<1x8x16xbf16> to vector<8x16xbf16>
    %98 = vector.extract_strided_slice %4 {offsets = [0, 128], sizes = [16, 256], strides = [1, 1]} : vector<16x512xbf16> to vector<16x256xbf16>
    %cst_62 = arith.constant dense<0.000000e+00> : vector<8x256xf32>
    %99 = tpu.matmul %97, %98, %cst_62 {dimension_numbers = #tpu.dot_dimension_numbers<[1], [0], [0], [1], [0, 0, 1, 1], [], []>} : vector<8x16xbf16>, vector<16x256xbf16>, vector<8x256xf32> -> vector<8x256xf32>
    %100 = arith.addf %95, %99 : vector<8x256xf32>
    %c19 = arith.constant 19 : index
    %c0_63 = arith.constant 0 : index
    %c0_64 = arith.constant 0 : index
    %101 = vector.load %arg2[%c19, %c0_63, %c0_64] : memref<27x8x16xbf16, #tpu.memory_space<vmem>>, vector<1x8x16xbf16>
    %102 = vector.shape_cast %101 : vector<1x8x16xbf16> to vector<8x16xbf16>
    %103 = vector.extract_strided_slice %4 {offsets = [0, 129], sizes = [16, 256], strides = [1, 1]} : vector<16x512xbf16> to vector<16x256xbf16>
    %cst_65 = arith.constant dense<0.000000e+00> : vector<8x256xf32>
    %104 = tpu.matmul %102, %103, %cst_65 {dimension_numbers = #tpu.dot_dimension_numbers<[1], [0], [0], [1], [0, 0, 1, 1], [], []>} : vector<8x16xbf16>, vector<16x256xbf16>, vector<8x256xf32> -> vector<8x256xf32>
    %105 = arith.addf %100, %104 : vector<8x256xf32>
    %c20 = arith.constant 20 : index
    %c0_66 = arith.constant 0 : index
    %c0_67 = arith.constant 0 : index
    %106 = vector.load %arg2[%c20, %c0_66, %c0_67] : memref<27x8x16xbf16, #tpu.memory_space<vmem>>, vector<1x8x16xbf16>
    %107 = vector.shape_cast %106 : vector<1x8x16xbf16> to vector<8x16xbf16>
    %108 = vector.extract_strided_slice %4 {offsets = [0, 130], sizes = [16, 256], strides = [1, 1]} : vector<16x512xbf16> to vector<16x256xbf16>
    %cst_68 = arith.constant dense<0.000000e+00> : vector<8x256xf32>
    %109 = tpu.matmul %107, %108, %cst_68 {dimension_numbers = #tpu.dot_dimension_numbers<[1], [0], [0], [1], [0, 0, 1, 1], [], []>} : vector<8x16xbf16>, vector<16x256xbf16>, vector<8x256xf32> -> vector<8x256xf32>
    %110 = arith.addf %105, %109 : vector<8x256xf32>
    %c21 = arith.constant 21 : index
    %c0_69 = arith.constant 0 : index
    %c0_70 = arith.constant 0 : index
    %111 = vector.load %arg2[%c21, %c0_69, %c0_70] : memref<27x8x16xbf16, #tpu.memory_space<vmem>>, vector<1x8x16xbf16>
    %112 = vector.shape_cast %111 : vector<1x8x16xbf16> to vector<8x16xbf16>
    %113 = vector.extract_strided_slice %4 {offsets = [0, 136], sizes = [16, 256], strides = [1, 1]} : vector<16x512xbf16> to vector<16x256xbf16>
    %cst_71 = arith.constant dense<0.000000e+00> : vector<8x256xf32>
    %114 = tpu.matmul %112, %113, %cst_71 {dimension_numbers = #tpu.dot_dimension_numbers<[1], [0], [0], [1], [0, 0, 1, 1], [], []>} : vector<8x16xbf16>, vector<16x256xbf16>, vector<8x256xf32> -> vector<8x256xf32>
    %115 = arith.addf %110, %114 : vector<8x256xf32>
    %c22 = arith.constant 22 : index
    %c0_72 = arith.constant 0 : index
    %c0_73 = arith.constant 0 : index
    %116 = vector.load %arg2[%c22, %c0_72, %c0_73] : memref<27x8x16xbf16, #tpu.memory_space<vmem>>, vector<1x8x16xbf16>
    %117 = vector.shape_cast %116 : vector<1x8x16xbf16> to vector<8x16xbf16>
    %118 = vector.extract_strided_slice %4 {offsets = [0, 137], sizes = [16, 256], strides = [1, 1]} : vector<16x512xbf16> to vector<16x256xbf16>
    %cst_74 = arith.constant dense<0.000000e+00> : vector<8x256xf32>
    %119 = tpu.matmul %117, %118, %cst_74 {dimension_numbers = #tpu.dot_dimension_numbers<[1], [0], [0], [1], [0, 0, 1, 1], [], []>} : vector<8x16xbf16>, vector<16x256xbf16>, vector<8x256xf32> -> vector<8x256xf32>
    %120 = arith.addf %115, %119 : vector<8x256xf32>
    %c23 = arith.constant 23 : index
    %c0_75 = arith.constant 0 : index
    %c0_76 = arith.constant 0 : index
    %121 = vector.load %arg2[%c23, %c0_75, %c0_76] : memref<27x8x16xbf16, #tpu.memory_space<vmem>>, vector<1x8x16xbf16>
    %122 = vector.shape_cast %121 : vector<1x8x16xbf16> to vector<8x16xbf16>
    %123 = vector.extract_strided_slice %4 {offsets = [0, 138], sizes = [16, 256], strides = [1, 1]} : vector<16x512xbf16> to vector<16x256xbf16>
    %cst_77 = arith.constant dense<0.000000e+00> : vector<8x256xf32>
    %124 = tpu.matmul %122, %123, %cst_77 {dimension_numbers = #tpu.dot_dimension_numbers<[1], [0], [0], [1], [0, 0, 1, 1], [], []>} : vector<8x16xbf16>, vector<16x256xbf16>, vector<8x256xf32> -> vector<8x256xf32>
    %125 = arith.addf %120, %124 : vector<8x256xf32>
    %c24 = arith.constant 24 : index
    %c0_78 = arith.constant 0 : index
    %c0_79 = arith.constant 0 : index
    %126 = vector.load %arg2[%c24, %c0_78, %c0_79] : memref<27x8x16xbf16, #tpu.memory_space<vmem>>, vector<1x8x16xbf16>
    %127 = vector.shape_cast %126 : vector<1x8x16xbf16> to vector<8x16xbf16>
    %128 = vector.extract_strided_slice %4 {offsets = [0, 144], sizes = [16, 256], strides = [1, 1]} : vector<16x512xbf16> to vector<16x256xbf16>
    %cst_80 = arith.constant dense<0.000000e+00> : vector<8x256xf32>
    %129 = tpu.matmul %127, %128, %cst_80 {dimension_numbers = #tpu.dot_dimension_numbers<[1], [0], [0], [1], [0, 0, 1, 1], [], []>} : vector<8x16xbf16>, vector<16x256xbf16>, vector<8x256xf32> -> vector<8x256xf32>
    %130 = arith.addf %125, %129 : vector<8x256xf32>
    %c25 = arith.constant 25 : index
    %c0_81 = arith.constant 0 : index
    %c0_82 = arith.constant 0 : index
    %131 = vector.load %arg2[%c25, %c0_81, %c0_82] : memref<27x8x16xbf16, #tpu.memory_space<vmem>>, vector<1x8x16xbf16>
    %132 = vector.shape_cast %131 : vector<1x8x16xbf16> to vector<8x16xbf16>
    %133 = vector.extract_strided_slice %4 {offsets = [0, 145], sizes = [16, 256], strides = [1, 1]} : vector<16x512xbf16> to vector<16x256xbf16>
    %cst_83 = arith.constant dense<0.000000e+00> : vector<8x256xf32>
    %134 = tpu.matmul %132, %133, %cst_83 {dimension_numbers = #tpu.dot_dimension_numbers<[1], [0], [0], [1], [0, 0, 1, 1], [], []>} : vector<8x16xbf16>, vector<16x256xbf16>, vector<8x256xf32> -> vector<8x256xf32>
    %135 = arith.addf %130, %134 : vector<8x256xf32>
    %c26 = arith.constant 26 : index
    %c0_84 = arith.constant 0 : index
    %c0_85 = arith.constant 0 : index
    %136 = vector.load %arg2[%c26, %c0_84, %c0_85] : memref<27x8x16xbf16, #tpu.memory_space<vmem>>, vector<1x8x16xbf16>
    %137 = vector.shape_cast %136 : vector<1x8x16xbf16> to vector<8x16xbf16>
    %138 = vector.extract_strided_slice %4 {offsets = [0, 146], sizes = [16, 256], strides = [1, 1]} : vector<16x512xbf16> to vector<16x256xbf16>
    %cst_86 = arith.constant dense<0.000000e+00> : vector<8x256xf32>
    %139 = tpu.matmul %137, %138, %cst_86 {dimension_numbers = #tpu.dot_dimension_numbers<[1], [0], [0], [1], [0, 0, 1, 1], [], []>} : vector<8x16xbf16>, vector<16x256xbf16>, vector<8x256xf32> -> vector<8x256xf32>
    %140 = arith.addf %135, %139 : vector<8x256xf32>
    %c0_87 = arith.constant 0 : index
    %c0_88 = arith.constant 0 : index
    %141 = vector.load %arg3[%c0_87, %c0_88] : memref<8x1xf32, #tpu.memory_space<vmem>>, vector<8x1xf32>
    %142 = vector.broadcast %141 : vector<8x1xf32> to vector<8x256xf32>
    %143 = arith.addf %140, %142 : vector<8x256xf32>
    %c0_89 = arith.constant 0 : index
    %c0_90 = arith.constant 0 : index
    %c0_91 = arith.constant 0 : index
    %144 = vector.load %arg6[%c0_89, %c0_90, %c0_91] : memref<1x8x256xf32, #tpu.memory_space<vmem>>, vector<1x8x256xf32>
    %145 = vector.shape_cast %144 : vector<1x8x256xf32> to vector<8x256xf32>
    %146 = vector.shape_cast %143 : vector<8x256xf32> to vector<1x8x256xf32>
    tpu.vector_store %arg6[%c0_89, %c0_90, %c0_91], %146 {strides = array<i32>} : memref<1x8x256xf32, #tpu.memory_space<vmem>>, vector<1x8x256xf32>,
    return
  }
  func.func @transform_0(%arg0: i32, %arg1: i32) -> (i32, i32, i32) {
    %c0_i32 = arith.constant 0 : i32
    %c0_i32_0 = arith.constant 0 : i32
    %c0_i32_1 = arith.constant 0 : i32
    %c0_i32_2 = arith.constant 0 : i32
    return %c0_i32, %c0_i32_0, %c0_i32_1 : i32, i32, i32
  }
  func.func @transform_1(%arg0: i32, %arg1: i32) -> (i32, i32) {
    %c0_i32 = arith.constant 0 : i32
    %c0_i32_0 = arith.constant 0 : i32
    %c0_i32_1 = arith.constant 0 : i32
    return %c0_i32, %c0_i32_0 : i32, i32
  }
  func.func @transform_2(%arg0: i32, %arg1: i32) -> (i32, i32, i32) {
    %c0_i32 = arith.constant 0 : i32
    %c0_i32_0 = arith.constant 0 : i32
    return %arg0, %c0_i32, %arg1 : i32, i32, i32
  }
  func.func @transform_3(%arg0: i32, %arg1: i32) -> (i32, i32, i32) {
    %c1_i32 = arith.constant 1 : i32
    %0 = arith.addi %arg1, %c1_i32 : i32
    %c0_i32 = arith.constant 0 : i32
    %c0_i32_0 = arith.constant 0 : i32
    return %arg0, %c0_i32, %0 : i32, i32, i32
  }
  func.func @transform_4(%arg0: i32, %arg1: i32) -> (i32, i32, i32) {
    %c0_i32 = arith.constant 0 : i32
    %c0_i32_0 = arith.constant 0 : i32
    return %arg0, %c0_i32, %arg1 : i32, i32, i32
  }
}

</mosaic_0001>

<bundles_post_ra>
// kernel: conv3d_pallas.1
= control target key start
LH: loop header
LB: loop body
LE: loop exit
PB: predicated region body
PF: predicated region fallthrough
CT: control target
= control target key end

     0   :  { %s1918_s15 = smov 0   ;;  %s1920_s16 = smov 0   ;;  %s2379_s0 = inlined_call_operand.vmem [shape: bf16[27,8,16], index: 0, kind: input, shape index: {}]   ;;  %s2380_s1 = inlined_call_operand.vmem [shape: f32[8,1], index: 1, kind: input, shape index: {}]   ;;  %s2381_s2 = inlined_call_operand.vmem [shape: bf16[2,16,768], index: 2, kind: input, shape index: {}, may-alias: {2,3}]   ;;  %s2382_s3 = inlined_call_operand.vmem [shape: bf16[2,16,768], index: 3, kind: input, shape index: {}, may-alias: {2,3}]   ;;  %s2383_s4 = inlined_call_operand.vmem [shape: f32[2,8,512], index: 4, kind: output, shape index: {}]  }
   0x1   :  { %s1922_s17 = smov 0   ;;  %s1924_s18 = smov 0  }
   0x2   :  { %s1926_s19 = smov 0   ;;  %s1928_s20 = smov 0  }
   0x3   :  { %s1930_s21 = smov 0   ;;  %s1932_s22 = smov 0  }
   0x4   :  { %s1934_s23 = smov 0  }
   0x5 LB: > { %s23_s24 = sadd.s32 1, %s1865_s21  ;;  %s26_s25 = sadd.s32 1, %s1869_s22  ;;  %s1873_s23 = sphi %s1934_s23, %s14_s23   ;;  %s1869_s22 = sphi %s1932_s22, %s2393_s22   ;;  %s1865_s21 = sphi %s1930_s21, %s2392_s21   ;;  %s1861_s20 = sphi %s1928_s20, %s2391_s20   ;;  %s1857_s19 = sphi %s1926_s19, %s2390_s19   ;;  %s1853_s18 = sphi %s1924_s18, %s2389_s18   ;;  %s1849_s17 = sphi %s1922_s17, %s2388_s17   ;;  %s1845_s16 = sphi %s1920_s16, %s2387_s16   ;;  %s1841_s15 = sphi %s1918_s15, %s2386_s15  }
   0x6   : > { %p24_p0 = scmp.ge.s32.totalorder %s23_s24, 2  ;;  %p84_p1 = scmp.ne.s32.totalorder %s1853_s18, %s1849_s17 }
   0x7   : > { %p85_p2 = scmp.eq.s32.totalorder %s1873_s23, 0  ;;  %s77_s5 = sadd.s32 1, %s1853_s18 }
   0x8   : > { %s1968_s26 = scalar_select %p24_p0, 0, %s23_s24  }
   0x9   : > { %s2395_s25 = smov (!%p24_p0, %s26_s25), %s1869_s22  ;;  %p1973_p3 = por %p85_p2, %p84_p1 }
   0xa   : > { %p28_p4 = scmp.ge.s32.totalorder %s2395_s25, 2  ;;  %s101_s28 = sadd.s32 1, %s1968_s26 }
   0xb   : > { %s73_s29 = ssub.s32 %s1865_s21, %s1968_s26  ;;  %s103_s30 = ssub.s32 %s23_s24, %s101_s28 }
   0xc   : > { %s2397_s25 = smov (%p28_p4, %s2395_s25), 0  ;;  %p114_p5 = scmp.ne.s32.totalorder %s1845_s16, %s1841_s15 }
   0xd   : > { %s72_s6 = ssub.s32 %s1869_s22, %s2397_s25  ;;  %s107_s7 = sadd.s32 1, %s1845_s16 }
   0xe   : > { %s74_s8 = sor.u32 %s73_s29, %s72_s6  ;;  %s104_s9 = sor.u32 %s103_s30, %s72_s6 }
   0xf   : > { %p75_p6 = scmp.eq.s32.totalorder %s74_s8, 0  ;;  %p105_p7 = scmp.eq.s32.totalorder %s104_s9, 0 }
  0x10   : > { %p1990_p8 = por %p114_p5, %p85_p2  ;;  %p1593_p9 = scmp.ge.s32.totalorder %s1873_s23, 4 }
  0x11   : > { %s1995_s11 = scalar_select %p75_p6, %s1853_s18, %s77_s5  }
  0x12   : > { %s1998_s12 = scalar_select %p105_p7, %s1845_s16, %s107_s7  }
  0x13   : > { %174 = sbr.rel (%p1593_p9) target bundleno = 44 (0x2c), region = 24 }
  0x18   : > { %177 = sbr.rel (!%p1973_p3) target bundleno = 34 (0x22), region = 28  ;;  %s179_s13 = sand.u32 (%p1973_p3), 1, %s1853_s18  }
  0x19   : > { %s1595_s14 = sshll.u32 (%p1973_p3), %s1865_s21, 1  ;;  %s1594_s24 = sshll.u32 (%p1973_p3), %s179_s13, 4 }
  0x1a   : > { %s1710_s28 = smul.u32 (%p1973_p3), 12, %s1869_s22  ;;  %s181_s8 = scalar_lea.vmem (%p1973_p3), [#allocation2], %s1594_s24 }
  0x1c   : > { %s184_s29 = sadd.s32 (%p1973_p3), %s1710_s28, %s1595_s14 }
  0x1d   : > { %s1596_s30 = sshll.u32 %s184_s29, 2 }
  0x1e   : > { %s186_s7 = scalar_lea.vmem %s2381_s2, %s1596_s30 }
  0x1f   : > { %v217_v0 = vld [vmem:[%s186_s7] sm:$0xff]  ;;  %v219_v1 = vld [vmem:[%s186_s7 + $0x18] sm:$0xff] }
  0x20   : > { %218 = vst [vmem:[%s181_s8] sm:$0xff] %v217_v0 }
  0x21   : > { %220 = vst [vmem:[%s181_s8 + $0x8] sm:$0xff] %v219_v1 }
  0x22 PF: > { %226 = sbr.rel (!%p1990_p8) target bundleno = 44 (0x2c), region = 66  ;;  %s228_s27 = sand.u32 (%p1990_p8), 1, %s1845_s16  }
  0x23   : > { %s1598_s9 = sshll.u32 (%p1990_p8), %s1865_s21, 1  ;;  %s1597_s13 = sshll.u32 (%p1990_p8), %s228_s27, 4 }
  0x24   : > { %s1515_s14 = smul.u32 (%p1990_p8), 12, %s1869_s22  ;;  %s230_s24 = scalar_lea.vmem (%p1990_p8), [#allocation3], %s1597_s13 }
  0x26   : > { %s1516_s28 = sadd.s32 (%p1990_p8), %s1598_s9, %s1515_s14 }
  0x27   : > { %s1599_s29 = sshll.u32 %s1516_s28, 2 }
  0x28   : > { %s1518_s5 = scalar_lea.vmem %s2382_s3, %s1599_s29 }
  0x29   : > { %v1600_v2 = vld [vmem:[%s1518_s5 + $0x8] sm:$0xff]  ;;  %v1601_v3 = vld [vmem:[%s1518_s5 + $0x20] sm:$0xff] }
  0x2a   : > { %268 = vst [vmem:[%s230_s24] sm:$0xff] %v1600_v2 }
  0x2b   : > { %270 = vst [vmem:[%s230_s24 + $0x8] sm:$0xff] %v1601_v3 }
  0x2c PF: > { %p1602_p10 = scmp.ge.s32.totalorder %s1873_s23, 1  ;;  %p275_p11 = scmp.lt.s32.totalorder %s1873_s23, 5 }
  0x2e   : > { %p276_p12 = pnand %p1602_p10, %p275_p11 }
  0x2f   : > { %s289_s10 = sand.u32 (!%p276_p12), 1, %s1841_s15   ;;  %s282_s8 = sand.u32 (!%p276_p12), 1, %s1849_s17  }
  0x30   : > { %279 = sbr.rel (%p276_p12) target bundleno = 526 (0x20e), region = 104  ;;  %s1604_s7 = sshll.u32 (!%p276_p12), %s289_s10, 4 }
  0x31   : > { %s1603_s27 = sshll.u32 (!%p276_p12), %s282_s8, 4  ;;  %s2021_s9 = scalar_lea.vmem (!%p276_p12), [#allocation3], %s1604_s7 }
  0x32   : > { %s284_s13 = scalar_lea.vmem (!%p276_p12), [#allocation2], %s1603_s27  ;;  %s1875_s14 = smov (!%p276_p12), 127  }
  0x33   : > { %s1876_s15 = smov (!%p276_p12), 126   ;;  %s1877_s17 = smov (!%p276_p12), 120  }
  0x34   : > { %s1878_s28 = smov (!%p276_p12), 119   ;;  %s1879_s29 = smov (!%p276_p12), 118  }
  0x35   : > { %v1618_v4 = vld [vmem:[%s2021_s9] sm:$0xf]  ;;  %v1709_v5 = vld [vmem:[%s2021_s9 + $0x4] sm:$0xf0]  ;;  %v1612_v8 = vld [vmem:[%s284_s13 + $0x8] sm:$0xf0] }
  0x36   : > { %v2025_v6 = vor.u32 %v1709_v5, %v1618_v4  ;;  %v1610_v7 = vld [vmem:[%s284_s13] sm:$0xf]  ;;  %v1707_v9 = vld [vmem:[%s284_s13 + $0x4] sm:$0xf0]  ;;  %v1706_v11 = vld [vmem:[%s284_s13 + $0x4] sm:$0xf] }
  0x37   : > { %v2027_v10 = vor.u32 %v1707_v9, %v1610_v7  ;;  %v2031_v12 = vor.u32 %v1706_v11, %v1612_v8  ;;  %s1880_s6 = smov 112   ;;  %s1881_s30 = smov 111   ;;  %v359_v13 = vld [vmem:[%s2379_s0] sm:$0xf]  ;;  %vm373_vm0 = vcmask 130048   ;;  %vm440_vm1 = vcmask 1031168  }
  0x38   : > { %366 = vrot.lane.b32.xlu1 %v2025_v6, %s1875_s14  ;;  %s1882_s5 = smov 110   ;;  %s1883_s24 = smov 64   ;;  %vm368_vm2 = vcmask 1039360   ;;  %v1624_v27 = vld [vmem:[%s2379_s0 + $0x4] sm:$0xf]  ;;  %vm484_vm3 = vcmask 982016  }
  0x39   : > { %362 = vrot.lane.b32.xlu0 %v2027_v10, %s1875_s14  ;;  %413 = vmatpush.bf16.msra.mxu2 %v2027_v10  ;;  %s1884_s10 = smov 63   ;;  %s1885_s7 = smov 62   ;;  %v1708_v29 = vld [vmem:[%s2021_s9 + $0x4] sm:$0xf]  ;;  %v1620_v30 = vld [vmem:[%s2021_s9 + $0x8] sm:$0xf0] }
  0x3a   : > { %436 = vrot.lane.b32.xlu2 %v2031_v12, %s1876_s15  ;;  %426 = vmatpush.bf16.msra.mxu3 %v2031_v12  ;;  %s1886_s13 = smov 56   ;;  %s1890_s8 = smov 47   ;;  %v1632_v35 = vld [vmem:[%s2379_s0 + $0xc] sm:$0xf]  ;;  %v1623_v36 = vor.u32 %v1708_v29, %v1620_v30  ;;  %vm528_vm4 = vcmask 973824   ;;  %vm572_vm5 = vcmask 965632  }
  0x3b   : > { %v1629_v42 = vld [vmem:[%s2379_s0 + $0x8] sm:$0xf]  ;;  %v1638_v47 = vld [vmem:[%s2379_s0 + $0x14] sm:$0xf]  ;;  %vm616_vm6 = vcmask 916480   ;;  %vm660_vm7 = vcmask 908288  }
  0x3c   : > { %1627 = vmatmul.msk.bf16.vlgmr.msra.gmra.mxu2 %vm373_vm0, %v359_v13  ;;  %v1635_v53 = vld [vmem:[%s2379_s0 + $0x10] sm:$0xf]  ;;  %v1644_v59 = vld [vmem:[%s2379_s0 + $0x1c] sm:$0xf]  ;;  %vm704_vm8 = vcmask 900096   ;;  %vm748_vm9 = vcmask 523264  }
  0x3d   : > { %1628 = vmatmul.msk.bf16.vlgmr.msra.gmra.mxu3 %vm373_vm0, %v359_v13  ;;  %v1641_v1 = vld [vmem:[%s2379_s0 + $0x18] sm:$0xf]  ;;  %v1650_v8 = vld [vmem:[%s2379_s0 + $0x24] sm:$0xf]  ;;  %vm792_vm10 = vcmask 515072   ;;  %vm836_vm11 = vcmask 506880  }
  0x3e   : > { %vm880_vm12 = vcmask 457728   ;;  %vm924_vm13 = vcmask 449536   ;;  %vm968_vm14 = vcmask 441344   ;;  %vm1012_vm15 = vcmask 392192   ;;  %p326_p13 = scmp.lt.s32.totalorder %s1861_s20, 1 }
  0x40   : > { %434 = vrot.lane.b32.xlu1 %v2027_v10, %s1876_s15  ;;  %s2399_s20 = smov (!%p326_p13, %s1861_s20), 1 }
  0x41   : > { %364 = vrot.lane.b32.xlu0 %v2031_v12, %s1875_s14 }
  0x42   : > { %438 = vrot.lane.b32.xlu2 %v2025_v6, %s1876_s15 }
  0x48   : > { %480 = vrot.lane.b32.xlu1 %v2031_v12, %s1877_s17 }
  0x49   : > { %478 = vrot.lane.b32.xlu0 %v2027_v10, %s1877_s17 }
  0x4a   : > { %482 = vrot.lane.b32.xlu2 %v2025_v6, %s1877_s17 }
  0x50   : > { %524 = vrot.lane.b32.xlu1 %v2031_v12, %s1878_s28 }
  0x51   : > { %522 = vrot.lane.b32.xlu0 %v2027_v10, %s1878_s28 }
  0x52   : > { %526 = vrot.lane.b32.xlu2 %v2025_v6, %s1878_s28 }
  0x58   : > { %568 = vrot.lane.b32.xlu1 %v2031_v12, %s1879_s29 }
  0x59   : > { %566 = vrot.lane.b32.xlu0 %v2027_v10, %s1879_s29 }
  0x5a   : > { %570 = vrot.lane.b32.xlu2 %v2025_v6, %s1879_s29 }
  0x60   : > { %612 = vrot.lane.b32.xlu1 %v2031_v12, %s1880_s6 }
  0x61   : > { %610 = vrot.lane.b32.xlu0 %v2027_v10, %s1880_s6 }
  0x62   : > { %614 = vrot.lane.b32.xlu2 %v2025_v6, %s1880_s6 }
  0x68   : > { %656 = vrot.lane.b32.xlu1 %v2031_v12, %s1881_s30 }
  0x69   : > { %654 = vrot.lane.b32.xlu0 %v2027_v10, %s1881_s30 }
  0x6a   : > { %658 = vrot.lane.b32.xlu2 %v2025_v6, %s1881_s30 }
  0x70   : > { %700 = vrot.lane.b32.xlu1 %v2031_v12, %s1882_s5 }
  0x71   : > { %698 = vrot.lane.b32.xlu0 %v2027_v10, %s1882_s5 }
  0x72   : > { %702 = vrot.lane.b32.xlu2 %v2025_v6, %s1882_s5 }
  0x78   : > { %744 = vrot.lane.b32.xlu1 %v2031_v12, %s1883_s24 }
  0x79   : > { %742 = vrot.lane.b32.xlu0 %v2027_v10, %s1883_s24 }
  0x7a   : > { %746 = vrot.lane.b32.xlu2 %v2025_v6, %s1883_s24  ;;  %s1887_s24 = smov 55  }
  0x80   : > { %788 = vrot.lane.b32.xlu1 %v2031_v12, %s1884_s10 }
  0x81   : > { %786 = vrot.lane.b32.xlu0 %v2027_v10, %s1884_s10 }
  0x82   : > { %790 = vrot.lane.b32.xlu2 %v2025_v6, %s1884_s10  ;;  %s1888_s10 = smov 54  }
  0x88   : > { %832 = vrot.lane.b32.xlu1 %v2031_v12, %s1885_s7 }
  0x89   : > { %830 = vrot.lane.b32.xlu0 %v2027_v10, %s1885_s7 }
  0x8a   : > { %834 = vrot.lane.b32.xlu2 %v2025_v6, %s1885_s7  ;;  %s1889_s7 = smov 48  }
  0x90   : > { %876 = vrot.lane.b32.xlu1 %v2031_v12, %s1886_s13 }
  0x91   : > { %874 = vrot.lane.b32.xlu0 %v2027_v10, %s1886_s13 }
  0x92   : > { %878 = vrot.lane.b32.xlu2 %v2025_v6, %s1886_s13 }
  0x94   : > { %v437_v14 = vpop.permute.xlu2 %436 }
  0x98   : > { %920 = vrot.lane.b32.xlu1 %v2031_v12, %s1887_s24 }
  0x99   : > { %918 = vrot.lane.b32.xlu0 %v2027_v10, %s1887_s24 }
  0x9a   : > { %922 = vrot.lane.b32.xlu2 %v2025_v6, %s1887_s24  ;;  %s1891_s24 = smov 46  }
  0x9c   : > { %v2101_v15 = vpop.permute.xlu2 %438 }
  0x9d   : > { %v2121_v23 = vsel %vm440_vm1, %v437_v14, %v2101_v15 }
  0xa0   : > { %964 = vrot.lane.b32.xlu1 %v2031_v12, %s1888_s10 }
  0xa1   : > { %962 = vrot.lane.b32.xlu0 %v2027_v10, %s1888_s10 }
  0xa2   : > { %966 = vrot.lane.b32.xlu2 %v2025_v6, %s1888_s10 }
  0xa4   : > { %v2106_v16 = vpop.permute.xlu2 %482 }
  0xa8   : > { %1008 = vrot.lane.b32.xlu1 %v2031_v12, %s1889_s7 }
  0xa9   : > { %1006 = vrot.lane.b32.xlu0 %v2027_v10, %s1889_s7 }
  0xaa   : > { %1010 = vrot.lane.b32.xlu2 %v2025_v6, %s1889_s7  ;;  %v2111_v17 = vpop.permute.xlu1 %366 }
  0xab   : > { %v363_v18 = vpop.permute.xlu0 %362 }
  0xac   : > { %v2113_v19 = vpop.permute.xlu2 %526 }
  0xb0   : > { %1052 = vrot.lane.b32.xlu1 %v2031_v12, %s1890_s8 }
  0xb1   : > { %1050 = vrot.lane.b32.xlu0 %v2027_v10, %s1890_s8 }
  0xb2   : > { %1054 = vrot.lane.b32.xlu2 %v2025_v6, %s1890_s8  ;;  %v435_v20 = vpop.permute.xlu1 %434 }
  0xb3   : > { %v365_v21 = vpop.permute.xlu0 %364  ;;  %v441_v22 = vsel %vm440_vm1, %v435_v20, %v437_v14  ;;  %v1647_v14 = vld [vmem:[%s2379_s0 + $0x20] sm:$0xf] }
  0xb4   : > { %v2123_v24 = vpop.permute.xlu2 %570  ;;  %v369_v25 = vsel %vm368_vm2, %v363_v18, %v365_v21  ;;  %v2128_v26 = vsel %vm368_vm2, %v365_v21, %v2111_v17 }
  0xb5   : > { %384 = vmatpush.bf16.msra.mxu0 %v369_v25  ;;  %397 = vmatpush.bf16.msra.mxu1 %v2128_v26 }
  0xb8   : > { %1625 = vmatmul.msk.bf16.vlgmr.msra.gmra.mxu0 %vm373_vm0, %v1624_v27  ;;  %1626 = vmatmul.msk.bf16.vlgmr.msra.gmra.mxu1 %vm373_vm0, %v1624_v27  ;;  %v1656_v27 = vld [vmem:[%s2379_s0 + $0x2c] sm:$0xf] }
  0xb9   : > { %455 = vmatpush.bf16.msrb.mxu0 %v441_v22  ;;  %468 = vmatpush.bf16.msrb.mxu1 %v2121_v23 }
  0xba   : > { %1096 = vrot.lane.b32.xlu1 %v2031_v12, %s1891_s24  ;;  %1094 = vrot.lane.b32.xlu0 %v2027_v10, %s1891_s24  ;;  %v481_v28 = vpop.permute.xlu1 %480 }
  0xbb   : > { %1098 = vrot.lane.b32.xlu2 %v2025_v6, %s1891_s24  ;;  %v479_v31 = vpop.permute.xlu0 %478  ;;  %v2144_v32 = vsel %vm484_vm3, %v481_v28, %v2106_v16 }
  0xbc   : > { %v2146_v33 = vpop.permute.xlu2 %614  ;;  %v485_v34 = vsel %vm484_vm3, %v479_v31, %v481_v28  ;;  %512 = vmatpush.bf16.msrb.mxu3 %v2144_v32 }
  0xbd   : > { %499 = vmatpush.bf16.msrb.mxu2 %v485_v34 }
  0xbf   : > { %1634 = vmatmul.msk.bf16.vlgmr.msrb.gmra.mxu3 %vm373_vm0, %v1632_v35 }
  0xc0   : > { %1633 = vmatmul.msk.bf16.vlgmr.msrb.gmra.mxu2 %vm373_vm0, %v1632_v35  ;;  %v1653_v35 = vld [vmem:[%s2379_s0 + $0x28] sm:$0xf] }
  0xc2   : > { %1208 = vrot.lane.b32.xlu1 %v1623_v36, %s1876_s15  ;;  %1171 = vrot.lane.b32.xlu0 %v1623_v36, %s1875_s14  ;;  %v525_v37 = vpop.permute.xlu1 %524 }
  0xc3   : > { %1245 = vrot.lane.b32.xlu2 %v1623_v36, %s1877_s17  ;;  %v2160_v38 = vsel %vm528_vm4, %v525_v37, %v2113_v19  ;;  %v523_v39 = vpop.permute.xlu0 %522 }
  0xc4   : > { %v2162_v40 = vpop.permute.xlu2 %658  ;;  %v529_v41 = vsel %vm528_vm4, %v523_v39, %v525_v37  ;;  %556 = vmatpush.bf16.msra.mxu1 %v2160_v38 }
  0xc5   : > { %543 = vmatpush.bf16.msra.mxu0 %v529_v41 }
  0xc8   : > { %1630 = vmatmul.msk.bf16.vlgmr.msrb.gmra.mxu0 %vm373_vm0, %v1629_v42  ;;  %1631 = vmatmul.msk.bf16.vlgmr.msrb.gmra.mxu1 %vm373_vm0, %v1629_v42 }
  0xca   : > { %1319 = vrot.lane.b32.xlu1 %v1623_v36, %s1879_s29  ;;  %1282 = vrot.lane.b32.xlu0 %v1623_v36, %s1878_s28  ;;  %v569_v43 = vpop.permute.xlu1 %568  ;;  %s1605_s28 = sshll.u32 %s1857_s19, 1  ;;  %s1606_s29 = sshll.u32 %s2399_s20, 2 }
  0xcb   : > { %1356 = vrot.lane.b32.xlu2 %v1623_v36, %s1880_s6  ;;  %v2176_v44 = vsel %vm572_vm5, %v569_v43, %v2123_v24  ;;  %v567_v45 = vpop.permute.xlu0 %566  ;;  %p328_p0 = scmp.lt.s32.totalorder %s1605_s28, 3 }
  0xcc   : > { %v573_v46 = vsel %vm572_vm5, %v567_v45, %v569_v43  ;;  %600 = vmatpush.bf16.msra.mxu3 %v2176_v44  ;;  %v2183_v48 = vpop.permute.xlu2 %702  ;;  %v1662_v43 = vld [vmem:[%s2379_s0 + $0x34] sm:$0xf] }
  0xcd   : > { %587 = vmatpush.bf16.msra.mxu2 %v573_v46  ;;  %s2401_s28 = smov (!%p328_p0, %s1605_s28), 3 }
  0xce   : > { %s331_s6 = sadd.s32 %s1606_s29, %s2401_s28 }
  0xcf   : > { %1640 = vmatmul.msk.bf16.vlgmr.msra.gmra.mxu3 %vm373_vm0, %v1638_v47  ;;  %s1607_s19 = sshll.u32 %s331_s6, 3 }
  0xd0   : > { %1639 = vmatmul.msk.bf16.vlgmr.msra.gmra.mxu2 %vm373_vm0, %v1638_v47  ;;  %s333_s27 = scalar_lea.vmem %s2383_s4, %s1607_s19 }
  0xd2   : > { %1430 = vrot.lane.b32.xlu1 %v1623_v36, %s1882_s5  ;;  %1393 = vrot.lane.b32.xlu0 %v1623_v36, %s1881_s30  ;;  %v613_v49 = vpop.permute.xlu1 %612 }
  0xd3   : > { %v2191_v50 = vsel %vm616_vm6, %v613_v49, %v2146_v33  ;;  %v611_v51 = vpop.permute.xlu0 %610 }
  0xd4   : > { %v617_v52 = vsel %vm616_vm6, %v611_v51, %v613_v49  ;;  %644 = vmatpush.bf16.msrb.mxu1 %v2191_v50  ;;  %v747_v54 = vpop.permute.xlu2 %746 }
  0xd5   : > { %631 = vmatpush.bf16.msrb.mxu0 %v617_v52  ;;  %v1659_v52 = vld [vmem:[%s2379_s0 + $0x30] sm:$0xf] }
  0xd8   : > { %1636 = vmatmul.msk.bf16.vlgmr.msra.gmra.mxu0 %vm373_vm0, %v1635_v53  ;;  %1637 = vmatmul.msk.bf16.vlgmr.msra.gmra.mxu1 %vm373_vm0, %v1635_v53  ;;  %v415_v53 = vpop.f32.mrf.mxu2 }
  0xda   : > { %v657_v55 = vpop.permute.xlu1 %656 }
  0xdb   : > { %v2202_v56 = vsel %vm660_vm7, %v657_v55, %v2162_v40  ;;  %v655_v57 = vpop.permute.xlu0 %654 }
  0xdc   : > { %v661_v58 = vsel %vm660_vm7, %v655_v57, %v657_v55  ;;  %688 = vmatpush.bf16.msrb.mxu3 %v2202_v56  ;;  %v791_v60 = vpop.permute.xlu2 %790 }
  0xdd   : > { %675 = vmatpush.bf16.msrb.mxu2 %v661_v58 }
  0xdf   : > { %1646 = vmatmul.msk.bf16.vlgmr.msrb.gmra.mxu3 %vm373_vm0, %v1644_v59 }
  0xe0   : > { %1645 = vmatmul.msk.bf16.vlgmr.msrb.gmra.mxu2 %vm373_vm0, %v1644_v59 }
  0xe2   : > { %v701_v61 = vpop.permute.xlu1 %700 }
  0xe3   : > { %v2213_v62 = vsel %vm704_vm8, %v701_v61, %v2183_v48  ;;  %v699_v63 = vpop.permute.xlu0 %698 }
  0xe4   : > { %v705_v0 = vsel %vm704_vm8, %v699_v63, %v701_v61  ;;  %732 = vmatpush.bf16.msra.mxu1 %v2213_v62  ;;  %v835_v5 = vpop.permute.xlu2 %834  ;;  %v417_v61 = vpop.f32.mrf.mxu2 }
  0xe5   : > { %719 = vmatpush.bf16.msra.mxu0 %v705_v0 }
  0xe8   : > { %1642 = vmatmul.msk.bf16.vlgmr.msrb.gmra.mxu0 %vm373_vm0, %v1641_v1  ;;  %1643 = vmatmul.msk.bf16.vlgmr.msrb.gmra.mxu1 %vm373_vm0, %v1641_v1 }
  0xea   : > { %v745_v2 = vpop.permute.xlu1 %744 }
  0xeb   : > { %v750_v3 = vsel %vm748_vm9, %v745_v2, %v747_v54  ;;  %v743_v4 = vpop.permute.xlu0 %742  ;;  %v428_v54 = vpop.f32.mrf.mxu3 }
  0xec   : > { %v749_v7 = vsel %vm748_vm9, %v743_v4, %v745_v2  ;;  %776 = vmatpush.bf16.msra.mxu3 %v750_v3  ;;  %v879_v18 = vpop.permute.xlu2 %878  ;;  %vm1056_vm9 = vcmask 384000  }
  0xed   : > { %763 = vmatpush.bf16.msra.mxu2 %v749_v7 }
  0xef   : > { %1652 = vmatmul.msk.bf16.vlgmr.msra.gmra.mxu3 %vm373_vm0, %v1650_v8 }
  0xf0   : > { %1651 = vmatmul.msk.bf16.vlgmr.msra.gmra.mxu2 %vm373_vm0, %v1650_v8 }
  0xf2   : > { %v789_v9 = vpop.permute.xlu1 %788 }
  0xf3   : > { %v794_v10 = vsel %vm792_vm10, %v789_v9, %v791_v60  ;;  %v787_v11 = vpop.permute.xlu0 %786  ;;  %v1668_v60 = vld [vmem:[%s2379_s0 + $0x3c] sm:$0xf]  ;;  %v430_v0 = vpop.f32.mrf.mxu3 }
  0xf4   : > { %v793_v13 = vsel %vm792_vm10, %v787_v11, %v789_v9  ;;  %820 = vmatpush.bf16.msrb.mxu1 %v794_v10  ;;  %v923_v28 = vpop.permute.xlu2 %922  ;;  %vm1100_vm10 = vcmask 375808  }
  0xf5   : > { %807 = vmatpush.bf16.msrb.mxu0 %v793_v13  ;;  %v1674_v13 = vld [vmem:[%s2379_s0 + $0x44] sm:$0xf] }
  0xf8   : > { %1648 = vmatmul.msk.bf16.vlgmr.msra.gmra.mxu0 %vm373_vm0, %v1647_v14  ;;  %1649 = vmatmul.msk.bf16.vlgmr.msra.gmra.mxu1 %vm373_vm0, %v1647_v14 }
  0xfa   : > { %v833_v20 = vpop.permute.xlu1 %832 }
  0xfb   : > { %v838_v21 = vsel %vm836_vm11, %v833_v20, %v835_v5  ;;  %v831_v22 = vpop.permute.xlu0 %830  ;;  %v1665_v5 = vld [vmem:[%s2379_s0 + $0x38] sm:$0xf] }
  0xfc   : > { %v837_v25 = vsel %vm836_vm11, %v831_v22, %v833_v20  ;;  %864 = vmatpush.bf16.msrb.mxu3 %v838_v21  ;;  %v967_v36 = vpop.permute.xlu2 %966 }
  0xfd   : > { %851 = vmatpush.bf16.msrb.mxu2 %v837_v25 }
  0xff   : > { %1658 = vmatmul.msk.bf16.vlgmr.msrb.gmra.mxu3 %vm373_vm0, %v1656_v27 }
 0x100   : > { %1657 = vmatmul.msk.bf16.vlgmr.msrb.gmra.mxu2 %vm373_vm0, %v1656_v27 }
 0x102   : > { %v877_v29 = vpop.permute.xlu1 %876 }
 0x103   : > { %v882_v30 = vsel %vm880_vm12, %v877_v29, %v879_v18  ;;  %v875_v31 = vpop.permute.xlu0 %874 }
 0x104   : > { %v881_v34 = vsel %vm880_vm12, %v875_v31, %v877_v29  ;;  %908 = vmatpush.bf16.msra.mxu1 %v882_v30  ;;  %v1011_v49 = vpop.permute.xlu2 %1010  ;;  %v1680_v29 = vld [vmem:[%s2379_s0 + $0x4c] sm:$0xf] }
 0x105   : > { %895 = vmatpush.bf16.msra.mxu0 %v881_v34 }
 0x108   : > { %1654 = vmatmul.msk.bf16.vlgmr.msrb.gmra.mxu0 %vm373_vm0, %v1653_v35  ;;  %1655 = vmatmul.msk.bf16.vlgmr.msrb.gmra.mxu1 %vm373_vm0, %v1653_v35 }
 0x10a   : > { %v921_v37 = vpop.permute.xlu1 %920 }
 0x10b   : > { %v926_v39 = vsel %vm924_vm13, %v921_v37, %v923_v28  ;;  %v919_v41 = vpop.permute.xlu0 %918 }
 0x10c   : > { %v925_v42 = vsel %vm924_vm13, %v919_v41, %v921_v37  ;;  %952 = vmatpush.bf16.msra.mxu3 %v926_v39  ;;  %v1055_v63 = vpop.permute.xlu2 %1054 }
 0x10d   : > { %939 = vmatpush.bf16.msra.mxu2 %v925_v42 }
 0x10f   : > { %1664 = vmatmul.msk.bf16.vlgmr.msra.gmra.mxu3 %vm373_vm0, %v1662_v43 }
 0x110   : > { %1663 = vmatmul.msk.bf16.vlgmr.msra.gmra.mxu2 %vm373_vm0, %v1662_v43 }
 0x112   : > { %v965_v45 = vpop.permute.xlu1 %964 }
 0x113   : > { %v970_v46 = vsel %vm968_vm14, %v965_v45, %v967_v36  ;;  %v963_v47 = vpop.permute.xlu0 %962  ;;  %v1677_v36 = vld [vmem:[%s2379_s0 + $0x48] sm:$0xf] }
 0x114   : > { %v969_v51 = vsel %vm968_vm14, %v963_v47, %v965_v45  ;;  %996 = vmatpush.bf16.msrb.mxu1 %v970_v46 }
 0x115   : > { %983 = vmatpush.bf16.msrb.mxu0 %v969_v51  ;;  %v1099_v7 = vpop.permute.xlu2 %1098 }
 0x118   : > { %1660 = vmatmul.msk.bf16.vlgmr.msra.gmra.mxu0 %vm373_vm0, %v1659_v52  ;;  %1661 = vmatmul.msk.bf16.vlgmr.msra.gmra.mxu1 %vm373_vm0, %v1659_v52 }
 0x11a   : > { %v1009_v55 = vpop.permute.xlu1 %1008 }
 0x11b   : > { %v1014_v57 = vsel %vm1012_vm15, %v1009_v55, %v1011_v49  ;;  %v1007_v58 = vpop.permute.xlu0 %1006  ;;  %v1686_v49 = vld [vmem:[%s2379_s0 + $0x54] sm:$0xf] }
 0x11c   : > { %v1013_v59 = vsel %vm1012_vm15, %v1007_v58, %v1009_v55  ;;  %1040 = vmatpush.bf16.msrb.mxu3 %v1014_v57  ;;  %v1683_v55 = vld [vmem:[%s2379_s0 + $0x50] sm:$0xf] }
 0x11d   : > { %1027 = vmatpush.bf16.msrb.mxu2 %v1013_v59 }
 0x11f   : > { %1670 = vmatmul.msk.bf16.vlgmr.msrb.gmra.mxu3 %vm373_vm0, %v1668_v60 }
 0x120   : > { %1669 = vmatmul.msk.bf16.vlgmr.msrb.gmra.mxu2 %vm373_vm0, %v1668_v60 }
 0x122   : > { %v1053_v1 = vpop.permute.xlu1 %1052 }
 0x123   : > { %v1058_v2 = vsel %vm1056_vm9, %v1053_v1, %v1055_v63  ;;  %v1051_v3 = vpop.permute.xlu0 %1050 }
 0x124   : > { %v1057_v4 = vsel %vm1056_vm9, %v1051_v3, %v1053_v1  ;;  %1084 = vmatpush.bf16.msra.mxu1 %v1058_v2  ;;  %v1692_v1 = vld [vmem:[%s2379_s0 + $0x5c] sm:$0xf] }
 0x125   : > { %1071 = vmatpush.bf16.msra.mxu0 %v1057_v4 }
 0x128   : > { %1666 = vmatmul.msk.bf16.vlgmr.msrb.gmra.mxu0 %vm373_vm0, %v1665_v5  ;;  %1667 = vmatmul.msk.bf16.vlgmr.msrb.gmra.mxu1 %vm373_vm0, %v1665_v5 }
 0x129   : > { %1148 = vmatpush.bf16.msrb.mxu0 %v2031_v12  ;;  %1161 = vmatpush.bf16.msrb.mxu1 %v2025_v6  ;;  %v1246_v12 = vpop.permute.xlu2 %1245 }
 0x12a   : > { %v1247_v20 = vsel %vm484_vm3, %v2106_v16, %v1246_v12 }
 0x12c   : > { %v1097_v8 = vpop.permute.xlu1 %1096  ;;  %v1095_v9 = vpop.permute.xlu0 %1094 }
 0x12d   : > { %v1102_v10 = vsel %vm1100_vm10, %v1097_v8, %v1099_v7  ;;  %v1101_v11 = vsel %vm1100_vm10, %v1095_v9, %v1097_v8 }
 0x12e   : > { %1115 = vmatpush.bf16.msra.mxu2 %v1101_v11  ;;  %1128 = vmatpush.bf16.msra.mxu3 %v1102_v10 }
 0x131   : > { %1675 = vmatmul.msk.bf16.vlgmr.msra.gmra.mxu2 %vm373_vm0, %v1674_v13  ;;  %1676 = vmatmul.msk.bf16.vlgmr.msra.gmra.mxu3 %vm373_vm0, %v1674_v13  ;;  %v1357_v51 = vpop.permute.xlu2 %1356 }
 0x132   : > { %1185 = vmatpush.bf16.msrb.mxu2 %v2128_v26  ;;  %v1671_v26 = vld [vmem:[%s2379_s0 + $0x40] sm:$0xf] }
 0x134   : > { %v1209_v6 = vpop.permute.xlu1 %1208  ;;  %v1172_v14 = vpop.permute.xlu0 %1171 }
 0x135   : > { %v1173_v18 = vsel %vm368_vm2, %v2111_v17, %v1172_v14  ;;  %v386_v21 = vpop.f32.mrf.mxu0  ;;  %v399_v22 = vpop.f32.mrf.mxu1 }
 0x136   : > { %1259 = vmatpush.bf16.msra.mxu2 %v2144_v32  ;;  %1198 = vmatpush.bf16.msrb.mxu3 %v1173_v18  ;;  %v416_v25 = vadd.f32 %v415_v53, %v386_v21  ;;  %v429_v27 = vadd.f32 %v428_v54, %v399_v22  ;;  %v1210_v32 = vsel %vm440_vm1, %v2101_v15, %v1209_v6  ;;  %v1698_v18 = vld [vmem:[%s2379_s0 + $0x64] sm:$0xf] }
 0x138   : > { %1672 = vmatmul.msk.bf16.vlgmr.msra.gmra.mxu0 %vm373_vm0, %v1671_v26  ;;  %1673 = vmatmul.msk.bf16.vlgmr.msra.gmra.mxu1 %vm373_vm0, %v1671_v26 }
 0x139   : > { %1222 = vmatpush.bf16.msra.mxu0 %v2121_v23  ;;  %1235 = vmatpush.bf16.msra.mxu1 %v1210_v32 }
 0x13a   : > { %1272 = vmatpush.bf16.msra.mxu3 %v1247_v20 }
 0x13c   : > { %v1320_v16 = vpop.permute.xlu1 %1319  ;;  %v1283_v15 = vpop.permute.xlu0 %1282 }
 0x13d   : > { %v388_v17 = vpop.f32.mrf.mxu0  ;;  %v401_v28 = vpop.f32.mrf.mxu1  ;;  %v1321_v30 = vsel %vm572_vm5, %v2123_v24, %v1320_v16  ;;  %v1284_v24 = vsel %vm528_vm4, %v2113_v19, %v1283_v15 }
 0x141   : > { %1681 = vmatmul.msk.bf16.vlgmr.msrb.gmra.mxu2 %vm373_vm0, %v1680_v29  ;;  %1682 = vmatmul.msk.bf16.vlgmr.msrb.gmra.mxu3 %vm373_vm0, %v1680_v29 }
 0x142   : > { %1333 = vmatpush.bf16.msrb.mxu2 %v2176_v44  ;;  %1346 = vmatpush.bf16.msrb.mxu3 %v1321_v30  ;;  %v514_v23 = vpop.f32.mrf.mxu3 }
 0x143   : > { %v501_v31 = vpop.f32.mrf.mxu2 }
 0x144   : > { %v1394_v43 = vpop.permute.xlu0 %1393  ;;  %v1431_v2 = vpop.permute.xlu1 %1430 }
 0x145   : > { %v457_v34 = vpop.f32.mrf.mxu0  ;;  %v470_v35 = vpop.f32.mrf.mxu1  ;;  %v1395_v19 = vsel %vm660_vm7, %v2162_v40, %v1394_v43  ;;  %v1358_v40 = vsel %vm616_vm6, %v2146_v33, %v1357_v51  ;;  %v1432_v9 = vsel %vm704_vm8, %v2183_v48, %v1431_v2 }
 0x146   : > { %v474_v37 = vadd.f32 %v457_v34, %v416_v25  ;;  %v475_v39 = vadd.f32 %v470_v35, %v429_v27  ;;  %v1701_v34 = vld [vmem:[%s2379_s0 + $0x68] sm:$0xf] }
 0x148   : > { %v518_v41 = vadd.f32 %v501_v31, %v474_v37  ;;  %v519_v42 = vadd.f32 %v514_v23, %v475_v39  ;;  %1678 = vmatmul.msk.bf16.vlgmr.msrb.gmra.mxu0 %vm373_vm0, %v1677_v36  ;;  %1679 = vmatmul.msk.bf16.vlgmr.msrb.gmra.mxu1 %vm373_vm0, %v1677_v36 }
 0x149   : > { %1296 = vmatpush.bf16.msrb.mxu0 %v2160_v38  ;;  %1309 = vmatpush.bf16.msrb.mxu1 %v1284_v24  ;;  %v1465_v24 = vld [vmem:[%s2380_s1] sm:$0xff] }
 0x14a   : > { %v516_v44 = vpop.f32.mrf.mxu3 }
 0x14b   : > { %v503_v45 = vpop.f32.mrf.mxu2 }
 0x14d   : > { %v459_v46 = vpop.f32.mrf.mxu0  ;;  %v472_v47 = vpop.f32.mrf.mxu1 }
 0x151   : > { %1687 = vmatmul.msk.bf16.vlgmr.msra.gmra.mxu2 %vm373_vm0, %v1686_v49  ;;  %1688 = vmatmul.msk.bf16.vlgmr.msra.gmra.mxu3 %vm373_vm0, %v1686_v49 }
 0x152   : > { %1407 = vmatpush.bf16.msra.mxu2 %v2202_v56  ;;  %1420 = vmatpush.bf16.msra.mxu3 %v1395_v19  ;;  %v602_v38 = vpop.f32.mrf.mxu3 }
 0x153   : > { %v589_v52 = vpop.f32.mrf.mxu2 }
 0x155   : > { %v545_v53 = vpop.f32.mrf.mxu0  ;;  %v558_v54 = vpop.f32.mrf.mxu1 }
 0x156   : > { %v562_v57 = vadd.f32 %v545_v53, %v518_v41  ;;  %v563_v58 = vadd.f32 %v558_v54, %v519_v42  ;;  %v1892_v41 = vmov 0  }
 0x157   : > { %1801 = vset.pattern.permute.xlu2 %v1892_v41  ;;  %1802 = vset.pattern.permute.xlu0 %v1892_v41 }
 0x158   : > { %v606_v59 = vadd.f32 %v589_v52, %v562_v57  ;;  %v607_v60 = vadd.f32 %v602_v38, %v563_v58  ;;  %1684 = vmatmul.msk.bf16.vlgmr.msra.gmra.mxu0 %vm373_vm0, %v1683_v55  ;;  %1685 = vmatmul.msk.bf16.vlgmr.msra.gmra.mxu1 %vm373_vm0, %v1683_v55 }
 0x159   : > { %1370 = vmatpush.bf16.msra.mxu0 %v2191_v50  ;;  %1383 = vmatpush.bf16.msra.mxu1 %v1358_v40  ;;  %v1689_v50 = vld [vmem:[%s2379_s0 + $0x58] sm:$0xf] }
 0x15a   : > { %v604_v56 = vpop.f32.mrf.mxu3  ;;  %1468 = vperm.xlu2 %1801, %v1465_v24  }
 0x15b   : > { %v591_v61 = vpop.f32.mrf.mxu2 }
 0x15d   : > { %v547_v63 = vpop.f32.mrf.mxu0  ;;  %v560_v0 = vpop.f32.mrf.mxu1 }
 0x161   : > { %1693 = vmatmul.msk.bf16.vlgmr.msrb.gmra.mxu2 %vm373_vm0, %v1692_v1  ;;  %1694 = vmatmul.msk.bf16.vlgmr.msrb.gmra.mxu3 %vm373_vm0, %v1692_v1 }
 0x162   : > { %v690_v33 = vpop.f32.mrf.mxu3 }
 0x163   : > { %v677_v3 = vpop.f32.mrf.mxu2 }
 0x165   : > { %v633_v4 = vpop.f32.mrf.mxu0  ;;  %v646_v5 = vpop.f32.mrf.mxu1 }
 0x166   : > { %v650_v7 = vadd.f32 %v633_v4, %v606_v59  ;;  %v651_v8 = vadd.f32 %v646_v5, %v607_v60 }
 0x168   : > { %v694_v10 = vadd.f32 %v677_v3, %v650_v7  ;;  %v695_v11 = vadd.f32 %v690_v33, %v651_v8  ;;  %1690 = vmatmul.msk.bf16.vlgmr.msrb.gmra.mxu0 %vm373_vm0, %v1689_v50  ;;  %1691 = vmatmul.msk.bf16.vlgmr.msrb.gmra.mxu1 %vm373_vm0, %v1689_v50 }
 0x169   : > { %1444 = vmatpush.bf16.msrb.mxu0 %v2213_v62  ;;  %1457 = vmatpush.bf16.msrb.mxu1 %v1432_v9  ;;  %v1695_v62 = vld [vmem:[%s2379_s0 + $0x60] sm:$0xf] }
 0x16a   : > { %v692_v13 = vpop.f32.mrf.mxu3 }
 0x16b   : > { %v679_v12 = vpop.f32.mrf.mxu2 }
 0x16d   : > { %v635_v6 = vpop.f32.mrf.mxu0  ;;  %v648_v14 = vpop.f32.mrf.mxu1 }
 0x171   : > { %1699 = vmatmul.msk.bf16.vlgmr.msra.gmra.mxu2 %vm373_vm0, %v1698_v18  ;;  %1700 = vmatmul.msk.bf16.vlgmr.msra.gmra.mxu3 %vm373_vm0, %v1698_v18 }
 0x172   : > { %v778_v48 = vpop.f32.mrf.mxu3 }
 0x173   : > { %v765_v20 = vpop.f32.mrf.mxu2 }
 0x175   : > { %v721_v21 = vpop.f32.mrf.mxu0  ;;  %v734_v22 = vpop.f32.mrf.mxu1 }
 0x176   : > { %v738_v26 = vadd.f32 %v721_v21, %v694_v10  ;;  %v739_v25 = vadd.f32 %v734_v22, %v695_v11 }
 0x178   : > { %v782_v27 = vadd.f32 %v765_v20, %v738_v26  ;;  %v783_v32 = vadd.f32 %v778_v48, %v739_v25  ;;  %1696 = vmatmul.msk.bf16.vlgmr.msra.gmra.mxu0 %vm373_vm0, %v1695_v62  ;;  %1697 = vmatmul.msk.bf16.vlgmr.msra.gmra.mxu1 %vm373_vm0, %v1695_v62 }
 0x17a   : > { %v780_v16 = vpop.f32.mrf.mxu3 }
 0x17b   : > { %v767_v17 = vpop.f32.mrf.mxu2 }
 0x17d   : > { %v723_v28 = vpop.f32.mrf.mxu0  ;;  %v736_v29 = vpop.f32.mrf.mxu1 }
 0x182   : > { %v866_v30 = vpop.f32.mrf.mxu3 }
 0x183   : > { %v853_v15 = vpop.f32.mrf.mxu2 }
 0x185   : > { %v809_v23 = vpop.f32.mrf.mxu0  ;;  %v822_v31 = vpop.f32.mrf.mxu1 }
 0x186   : > { %v826_v35 = vadd.f32 %v809_v23, %v782_v27  ;;  %v827_v36 = vadd.f32 %v822_v31, %v783_v32 }
 0x188   : > { %v870_v37 = vadd.f32 %v853_v15, %v826_v35  ;;  %v871_v39 = vadd.f32 %v866_v30, %v827_v36  ;;  %1702 = vmatmul.msk.bf16.vlgmr.msrb.gmra.mxu0 %vm373_vm0, %v1701_v34  ;;  %1703 = vmatmul.msk.bf16.vlgmr.msrb.gmra.mxu1 %vm373_vm0, %v1701_v34 }
 0x18a   : > { %v868_v42 = vpop.f32.mrf.mxu3 }
 0x18b   : > { %v855_v44 = vpop.f32.mrf.mxu2 }
 0x18d   : > { %v811_v43 = vpop.f32.mrf.mxu0  ;;  %v824_v45 = vpop.f32.mrf.mxu1 }
 0x192   : > { %v954_v46 = vpop.f32.mrf.mxu3 }
 0x193   : > { %v941_v47 = vpop.f32.mrf.mxu2 }
 0x195   : > { %v897_v49 = vpop.f32.mrf.mxu0  ;;  %v910_v19 = vpop.f32.mrf.mxu1 }
 0x196   : > { %v914_v38 = vadd.f32 %v897_v49, %v870_v37  ;;  %v915_v51 = vadd.f32 %v910_v19, %v871_v39 }
 0x198   : > { %v958_v52 = vadd.f32 %v941_v47, %v914_v38  ;;  %v959_v53 = vadd.f32 %v954_v46, %v915_v51 }
 0x19a   : > { %v956_v54 = vpop.f32.mrf.mxu3 }
 0x19b   : > { %v943_v55 = vpop.f32.mrf.mxu2 }
 0x19d   : > { %v899_v57 = vpop.f32.mrf.mxu0  ;;  %v912_v58 = vpop.f32.mrf.mxu1 }
 0x1a2   : > { %v1042_v40 = vpop.f32.mrf.mxu3 }
 0x1a3   : > { %v1029_v59 = vpop.f32.mrf.mxu2 }
 0x1a5   : > { %v985_v60 = vpop.f32.mrf.mxu0  ;;  %v998_v56 = vpop.f32.mrf.mxu1 }
 0x1a6   : > { %v1002_v61 = vadd.f32 %v985_v60, %v958_v52  ;;  %v1003_v63 = vadd.f32 %v998_v56, %v959_v53 }
 0x1a8   : > { %v1046_v0 = vadd.f32 %v1029_v59, %v1002_v61  ;;  %v1047_v1 = vadd.f32 %v1042_v40, %v1003_v63 }
 0x1aa   : > { %v1044_v33 = vpop.f32.mrf.mxu3 }
 0x1ab   : > { %v1031_v2 = vpop.f32.mrf.mxu2 }
 0x1ad   : > { %v987_v3 = vpop.f32.mrf.mxu0  ;;  %v1000_v4 = vpop.f32.mrf.mxu1 }
 0x1b4   : > { %v1130_v5 = vpop.f32.mrf.mxu3  ;;  %v1117_v50 = vpop.f32.mrf.mxu2 }
 0x1b5   : > { %v1073_v7 = vpop.f32.mrf.mxu0  ;;  %v1086_v8 = vpop.f32.mrf.mxu1 }
 0x1b6   : > { %v1091_v9 = vadd.f32 %v1086_v8, %v1047_v1  ;;  %v1090_v35 = vadd.f32 %v1073_v7, %v1046_v0  ;;  %v1469_v33 = vpop.permute.xlu2 %1468 }
 0x1b8   : > { %v1135_v10 = vadd.f32 %v1130_v5, %v1091_v9  ;;  %v1134_v37 = vadd.f32 %v1117_v50, %v1090_v35 }
 0x1bc   : > { %v1132_v11 = vpop.f32.mrf.mxu3  ;;  %v1119_v13 = vpop.f32.mrf.mxu2 }
 0x1bd   : > { %v1075_v12 = vpop.f32.mrf.mxu0  ;;  %v1088_v6 = vpop.f32.mrf.mxu1 }
 0x1c4   : > { %v1200_v14 = vpop.f32.mrf.mxu3  ;;  %v1187_v18 = vpop.f32.mrf.mxu2 }
 0x1c5   : > { %v1150_v48 = vpop.f32.mrf.mxu0  ;;  %v1163_v20 = vpop.f32.mrf.mxu1 }
 0x1c6   : > { %v1167_v42 = vadd.f32 %v1150_v48, %v1134_v37  ;;  %v1168_v44 = vadd.f32 %v1163_v20, %v1135_v10 }
 0x1c8   : > { %v1204_v43 = vadd.f32 %v1187_v18, %v1167_v42  ;;  %v1205_v45 = vadd.f32 %v1200_v14, %v1168_v44 }
 0x1cc   : > { %v1202_v21 = vpop.f32.mrf.mxu3  ;;  %v1189_v22 = vpop.f32.mrf.mxu2 }
 0x1cd   : > { %v1152_v62 = vpop.f32.mrf.mxu0  ;;  %v1165_v26 = vpop.f32.mrf.mxu1 }
 0x1d4   : > { %v1274_v25 = vpop.f32.mrf.mxu3  ;;  %v1261_v27 = vpop.f32.mrf.mxu2 }
 0x1d5   : > { %v1224_v32 = vpop.f32.mrf.mxu0  ;;  %v1237_v16 = vpop.f32.mrf.mxu1 }
 0x1d6   : > { %v1241_v47 = vadd.f32 %v1224_v32, %v1204_v43  ;;  %v1242_v49 = vadd.f32 %v1237_v16, %v1205_v45 }
 0x1d8   : > { %v1278_v52 = vadd.f32 %v1261_v27, %v1241_v47  ;;  %v1279_v53 = vadd.f32 %v1274_v25, %v1242_v49 }
 0x1dc   : > { %v1276_v17 = vpop.f32.mrf.mxu3  ;;  %v1263_v28 = vpop.f32.mrf.mxu2 }
 0x1dd   : > { %v1226_v29 = vpop.f32.mrf.mxu0  ;;  %v1239_v30 = vpop.f32.mrf.mxu1 }
 0x1e4   : > { %v1348_v15 = vpop.f32.mrf.mxu3  ;;  %v1335_v23 = vpop.f32.mrf.mxu2 }
 0x1e5   : > { %v1298_v31 = vpop.f32.mrf.mxu0  ;;  %v1311_v34 = vpop.f32.mrf.mxu1 }
 0x1e6   : > { %v1315_v54 = vadd.f32 %v1298_v31, %v1278_v52  ;;  %v1316_v55 = vadd.f32 %v1311_v34, %v1279_v53 }
 0x1e8   : > { %v1352_v60 = vadd.f32 %v1335_v23, %v1315_v54  ;;  %v1353_v56 = vadd.f32 %v1348_v15, %v1316_v55 }
 0x1ec   : > { %v1350_v36 = vpop.f32.mrf.mxu3  ;;  %v1337_v39 = vpop.f32.mrf.mxu2 }
 0x1ed   : > { %v1300_v24 = vpop.f32.mrf.mxu0  ;;  %v1313_v41 = vpop.f32.mrf.mxu1 }
 0x1f4   : > { %v1422_v46 = vpop.f32.mrf.mxu3  ;;  %v1409_v19 = vpop.f32.mrf.mxu2 }
 0x1f5   : > { %v1372_v38 = vpop.f32.mrf.mxu0  ;;  %v1385_v51 = vpop.f32.mrf.mxu1 }
 0x1f6   : > { %v1389_v61 = vadd.f32 %v1372_v38, %v1352_v60  ;;  %v1390_v63 = vadd.f32 %v1385_v51, %v1353_v56 }
 0x1f8   : > { %v1426_v0 = vadd.f32 %v1409_v19, %v1389_v61  ;;  %v1427_v1 = vadd.f32 %v1422_v46, %v1390_v63 }
 0x1fc   : > { %v1424_v57 = vpop.f32.mrf.mxu3  ;;  %v1411_v58 = vpop.f32.mrf.mxu2 }
 0x1fd   : > { %v1374_v40 = vpop.f32.mrf.mxu0  ;;  %v1387_v59 = vpop.f32.mrf.mxu1 }
 0x205   : > { %v1446_v2 = vpop.f32.mrf.mxu0  ;;  %v1459_v3 = vpop.f32.mrf.mxu1 }
 0x206   : > { %v1463_v4 = vadd.f32 %v1446_v2, %v1426_v0  ;;  %v1464_v5 = vadd.f32 %v1459_v3, %v1427_v1 }
 0x208   : > { %v1471_v50 = vadd.f32 %v1469_v33, %v1463_v4  ;;  %v1472_v7 = vadd.f32 %v1469_v33, %v1464_v5 }
 0x20a   : > { %1473 = vst [vmem:[%s333_s27] sm:$0xff] %v1471_v50 }
 0x20b   : > { %1474 = vst [vmem:[%s333_s27 + $0x8] sm:$0xff] %v1472_v7 }
 0x20d   : > { %v1448_v8 = vpop.f32.mrf.mxu0  ;;  %v1461_v9 = vpop.f32.mrf.mxu1 }
 0x20e PF: > { %s14_s23 = sadd.s32 1, %s1873_s23   ;;  %s2386_s15 = smov %s1845_s16 }
 0x20f   : > { %p11_p1 = scmp.ge.s32.totalorder %s14_s23, 6   ;;  %s2387_s16 = smov %s1998_s12 }
 0x210   : > { %s2388_s17 = smov %s1853_s18  ;;  %s2389_s18 = smov %s1995_s11 }
 0x211   : > { %s2390_s19 = smov %s1865_s21  ;;  %s2391_s20 = smov %s1869_s22 }
 0x212   : > { %s2392_s21 = smov %s1968_s26  ;;  %s2393_s22 = smov %s2397_s25 }
 0x213   :  { %13 = sbr.rel (!%p11_p1) target bundleno = 5 (0x5), region = 181 }

</bundles_post_ra>
